<compile_context>
chip_gen: v7x
topology: tpu7x:2x2x1
jax: 0.10.0
libtpu: 0.0.40
codegen_flags: <defaults>
</compile_context>

<pallas_src>
import jax
import jax.numpy as jnp
from jax.experimental import pallas as pl
from jax.experimental.pallas import tpu as pltpu


def _cdiv(a, b):
    return (a + b - 1) // b


def _round_up(a, m):
    return _cdiv(a, m) * m


def _pick_batch_tile(B, tb_max):
    """Batch tile: multiple of 8, as large as possible (amortise ~0.35us/step),
    but giving >= 2 grid blocks when B allows (v7x megacore sharding)."""
    tb_max = max(8, _round_up(tb_max, 8))
    if B <= 8:
        return 8
    return min(tb_max, _round_up(_cdiv(B, 2), 8))


def _fused_kernel(x_ref, w_ref, b_ref, o_ref):
    # x_ref: (TB, K)   batch tile of flattened sensory inputs, native dtype
    # w_ref: (K, N)    fused bilinear weight (compute dtype), resident across grid
    # b_ref: (1, N)    fused bias, f32
    # o_ref: (TB, T*N) lane-dense output with the timestep broadcast folded in
    z = jnp.dot(x_ref[...].astype(w_ref.dtype), w_ref[...],
                preferred_element_type=jnp.float32) + b_ref[...]
    reps = o_ref.shape[-1] // b_ref.shape[-1]          # = num_timesteps (or 1)
    o_ref[...] = jnp.tile(z, (1, reps)).astype(o_ref.dtype)


def make_fused_params(w0, w1, b0=None, b1=None, *, compute_dtype=jnp.bfloat16):
    """Precompute the fused weight/bias ONCE at parameter-setup time.

    w0: (P0, S0), w1: (P1, S1)  (torch nn.Linear layout [out, in])
    Returns w_comb: (S0*S1, P1*P0) in compute_dtype, b_comb: (1, P1*P0) f32.
    Row index s0*S1+s1 matches x.reshape(B, S0*S1); column index p1*P0+p0
    matches PyTorch's (P1, P0) row-major flatten.
    """
    P0, S0 = w0.shape
    P1, S1 = w1.shape
    w0f = w0.astype(jnp.float32)
    w1f = w1.astype(jnp.float32)
    b0f = jnp.zeros((P0,), jnp.float32) if b0 is None else b0.astype(jnp.float32)
    b1f = jnp.zeros((P1,), jnp.float32) if b1 is None else b1.astype(jnp.float32)

    w_comb = jnp.einsum('ps,qt->stqp', w0f, w1f).reshape(S0 * S1, P1 * P0)
    w_comb = w_comb.astype(compute_dtype)
    b_comb = (b1f[:, None] * jnp.sum(w0f, axis=1)[None, :]
              + b0f[None, :]).reshape(1, P1 * P0)
    return w_comb, b_comb


def factorised_input_block_fused(x, w_comb, b_comb, num_timesteps, *,
                                 tb_max=512, materialise_timesteps=True):
    """Forward pass given pre-fused params.  x: [..., S0, S1].

    Returns [..., num_timesteps, P0*P1] (or [..., P0*P1] when
    materialise_timesteps=False)."""
    *lead, S0, S1 = x.shape
    K, N = w_comb.shape
    assert K == S0 * S1, (K, S0, S1)

    B = 1
    for d in lead:
        B *= d
    xf = x.reshape(B, K)                      # native dtype; cast happens in-kernel

    reps = num_timesteps if materialise_timesteps else 1
    NT = reps * N

    TB = _pick_batch_tile(B, tb_max)
    grid = (_cdiv(B, TB),)                    # partial last block handled by Pallas

    cost = pl.CostEstimate(
        flops=2 * B * K * N,
        transcendentals=0,
        bytes_accessed=(xf.size * xf.dtype.itemsize
                        + w_comb.size * w_comb.dtype.itemsize
                        + b_comb.size * b_comb.dtype.itemsize
                        + B * NT * 4))

    flat = pl.pallas_call(
        _fused_kernel,
        out_shape=jax.ShapeDtypeStruct((B, NT), jnp.float32),
        grid=grid,
        in_specs=[
            pl.BlockSpec((TB, K), lambda i: (i, 0)),   # batch tile of x
            pl.BlockSpec((K, N), lambda i: (0, 0)),    # resident fused weight
            pl.BlockSpec((1, N), lambda i: (0, 0)),    # resident fused bias
        ],
        out_specs=pl.BlockSpec((TB, NT), lambda i: (i, 0)),
        compiler_params=pltpu.CompilerParams(
            dimension_semantics=("parallel",)),
        cost_estimate=cost,
    )(xf, w_comb, b_comb)

    if materialise_timesteps:
        return flat.reshape(*lead, num_timesteps, N)
    return flat.reshape(*lead, N)


def factorised_input_block(x, w0, w1, b0, b1, num_timesteps, *,
                           compute_dtype=jnp.bfloat16, **kwargs):
    """Convenience wrapper.  Prefer calling make_fused_params once at setup and
    factorised_input_block_fused per forward (hoists the O(K*N) fusion)."""
    w_comb, b_comb = make_fused_params(w0, w1, b0, b1, compute_dtype=compute_dtype)
    return factorised_input_block_fused(x, w_comb, b_comb, num_timesteps, **kwargs)


def _reference(x, w0, w1, b0, b1, num_timesteps):
    """Pure-JAX transcription of the PyTorch forward (sequential projections)."""
    xf = x.astype(jnp.float32)
    y = jnp.einsum('...ij,kj->...ik', xf, w0 * 0 + w1) + b1      # feature_1_proj
    yt = jnp.swapaxes(y, -2, -1)                                 # transpose(-2,-1)
    z = jnp.einsum('...ij,kj->...ik', yt, w0) + b0               # feature_0_proj
    flat = z.reshape(*z.shape[:-2], -1)
    return jnp.broadcast_to(
        flat[..., None, :],
        (*flat.shape[:-1], num_timesteps, flat.shape[-1]))


if __name__ == "__main__":
    # Module config: sensory_shape = (S0, S1), feature_projection_sizes = (P0, P1)
    S0, S1 = 16, 16
    P0, P1 = 8, 8
    lead = (2, 8)          # B = 16 -> 2 batch tiles of 8 (even grid, v7x-friendly)
    T = 4                  # num_timesteps; T*P0*P1 = 256 lanes -> lane-dense stores

    key = jax.random.PRNGKey(0)
    kx, kw0, kw1, kb0, kb1 = jax.random.split(key, 5)

    x = jax.random.normal(kx, (*lead, S0, S1), dtype=jnp.float32)
    # deterministic "nn.Linear"-style init (uniform in +-1/sqrt(fan_in))
    w0 = jax.random.uniform(kw0, (P0, S0), jnp.float32, -1.0, 1.0) / jnp.sqrt(S0)
    w1 = jax.random.uniform(kw1, (P1, S1), jnp.float32, -1.0, 1.0) / jnp.sqrt(S1)
    b0 = jax.random.uniform(kb0, (P0,), jnp.float32, -1.0, 1.0) / jnp.sqrt(S0)
    b1 = jax.random.uniform(kb1, (P1,), jnp.float32, -1.0, 1.0) / jnp.sqrt(S1)

    ref = jax.block_until_ready(_reference(x, w0, w1, b0, b1, T))

    # Exact (f32-compute) path — tight tolerance against the sequential reference.
    wc32, bc32 = make_fused_params(w0, w1, b0, b1, compute_dtype=jnp.float32)
    out32 = jax.block_until_ready(factorised_input_block_fused(x, wc32, bc32, T))
    assert out32.shape == (*lead, T, P0 * P1), out32.shape
    assert jnp.allclose(out32, ref, atol=1e-4, rtol=1e-4), \
        float(jnp.max(jnp.abs(out32 - ref)))

    # Fast (bf16 MXU) path — params fused & cast once at setup; looser tolerance
    # because the W0xW1 product (not the intermediate activation) is rounded.
    wcbf, bcbf = make_fused_params(w0, w1, b0, b1, compute_dtype=jnp.bfloat16)
    outbf = jax.block_until_ready(factorised_input_block_fused(x, wcbf, bcbf, T))
    assert outbf.shape == (*lead, T, P0 * P1), outbf.shape
    max_err = float(jnp.max(jnp.abs(outbf - ref)))
    assert max_err < 3e-2, max_err

    print("KERNEL_OK")
</pallas_src>

<mosaic_0001>
module attributes {stable_mosaic.version = 11 : i64} {
  func.func @_fused_kernel(%arg0: i32, %arg1: memref<8x256xf32, #tpu.memory_space<vmem>>, %arg2: memref<256x64xf32, #tpu.memory_space<vmem>>, %arg3: memref<1x64xf32, #tpu.memory_space<vmem>>, %arg4: memref<8x256xf32, #tpu.memory_space<vmem>>) attributes {dimension_semantics = [#tpu.dimension_semantics<parallel>], iteration_bounds = array<i64: 2>, scalar_prefetch = 0 : i64, scratch_operands = 0 : i64, tpu.core_type = #tpu.core_type<tc>, window_params = [{transform_indices = @transform_0, window_bounds = array<i64: 8, 256>}, {pipeline_mode = #tpu.pipeline_mode<synchronous>, transform_indices = @transform_1, window_bounds = array<i64: 256, 64>}, {pipeline_mode = #tpu.pipeline_mode<synchronous>, transform_indices = @transform_2, window_bounds = array<i64: 1, 64>}, {transform_indices = @transform_3, window_bounds = array<i64: 8, 256>}]} {
    %c0 = arith.constant 0 : index
    %c0_0 = arith.constant 0 : index
    %0 = vector.load %arg1[%c0, %c0_0] : memref<8x256xf32, #tpu.memory_space<vmem>>, vector<8x256xf32>
    %c0_1 = arith.constant 0 : index
    %c0_2 = arith.constant 0 : index
    %1 = vector.load %arg2[%c0_1, %c0_2] : memref<256x64xf32, #tpu.memory_space<vmem>>, vector<256x64xf32>
    %cst = arith.constant dense<0.000000e+00> : vector<8x64xf32>
    %2 = tpu.matmul %0, %1, %cst {dimension_numbers = #tpu.dot_dimension_numbers<[1], [0], [0], [1], [0, 0, 1, 1], [], []>} : vector<8x256xf32>, vector<256x64xf32>, vector<8x64xf32> -> vector<8x64xf32>
    %c0_3 = arith.constant 0 : index
    %c0_4 = arith.constant 0 : index
    %3 = vector.load %arg3[%c0_3, %c0_4] : memref<1x64xf32, #tpu.memory_space<vmem>>, vector<1x64xf32>
    %4 = vector.broadcast %3 : vector<1x64xf32> to vector<8x64xf32>
    %5 = arith.addf %2, %4 : vector<8x64xf32>
    %6 = tpu.concatenate %5, %5, %5, %5 in 1 : vector<8x64xf32>, vector<8x64xf32>, vector<8x64xf32>, vector<8x64xf32> -> vector<8x256xf32>
    %c0_5 = arith.constant 0 : index
    %c0_6 = arith.constant 0 : index
    %7 = vector.load %arg4[%c0_5, %c0_6] : memref<8x256xf32, #tpu.memory_space<vmem>>, vector<8x256xf32>
    tpu.vector_store %arg4[%c0_5, %c0_6], %6 {strides = array<i32>} : memref<8x256xf32, #tpu.memory_space<vmem>>, vector<8x256xf32>,
    return
  }
  func.func @transform_0(%arg0: i32) -> (i32, i32) {
    %c0_i32 = arith.constant 0 : i32
    %c0_i32_0 = arith.constant 0 : i32
    return %arg0, %c0_i32 : i32, i32
  }
  func.func @transform_1(%arg0: i32) -> (i32, i32) {
    %c0_i32 = arith.constant 0 : i32
    %c0_i32_0 = arith.constant 0 : i32
    %c0_i32_1 = arith.constant 0 : i32
    return %c0_i32, %c0_i32_0 : i32, i32
  }
  func.func @transform_2(%arg0: i32) -> (i32, i32) {
    %c0_i32 = arith.constant 0 : i32
    %c0_i32_0 = arith.constant 0 : i32
    %c0_i32_1 = arith.constant 0 : i32
    return %c0_i32, %c0_i32_0 : i32, i32
  }
  func.func @transform_3(%arg0: i32) -> (i32, i32) {
    %c0_i32 = arith.constant 0 : i32
    %c0_i32_0 = arith.constant 0 : i32
    return %arg0, %c0_i32 : i32, i32
  }
}

</mosaic_0001>

<bundles_post_ra>
// kernel: tpu_custom_call.1
= control target key start
LH: loop header
LB: loop body
LE: loop exit
PB: predicated region body
PF: predicated region fallthrough
CT: control target
= control target key end

     0   :  { %8 = vsyncpa [#allocation3], 0  ;;  %s773_s0 = inlined_call_operand.vmem [shape: f32[16,256], index: 0, kind: input, shape index: {}]   ;;  %s774_s1 = inlined_call_operand.vmem [shape: f32[256,64], index: 1, kind: input, shape index: {}]   ;;  %s775_s2 = inlined_call_operand.vmem [shape: f32[1,64], index: 2, kind: input, shape index: {}]   ;;  %s776_s3 = inlined_call_operand.hbm [shape: f32[16,256], index: 3, kind: output, shape index: {}]  }
   0x1   :  { %10 = vsyncpa [#allocation3 + $0x1], 0  ;;  %s570_s12 = smov 0   ;;  %s572_s13 = smov 0  }
   0x2   :  { %s574_s14 = smov 0   ;;  %s576_s15 = smov 0  }
   0x3 LB: > { %s591_s16 = sadd.s32 4294967295, %s546_s15   ;;  %s362_s17 = sadd.s32 4294967294, %s546_s15   ;;  %s546_s15 = sphi %s576_s15, %s782_s15   ;;  %s542_s14 = sphi %s574_s14, %s781_s14   ;;  %s538_s13 = sphi %s572_s13, %s780_s13   ;;  %s534_s12 = sphi %s570_s12, %s779_s12  }
   0x4   : > { %s595_s18 = sadd.s32 1, %s546_s15   ;;  %s91_s19 = sadd.s32 1, %s542_s14 }
   0x5   : > { %s88_s20 = ssub.s32 %s546_s15, %s595_s18  ;;  %p101_p0 = scmp.ne.s32.totalorder %s542_s14, %s538_s13 }
   0x6   : > { %p89_p1 = scmp.eq.s32.totalorder %s88_s20, 0  ;;  %p102_p2 = scmp.eq.s32.totalorder %s591_s16, 1 }
   0x7   : > { %p107_p3 = scmp.ne.s32.totalorder %s538_s13, %s534_s12  ;;  %p108_p4 = scmp.eq.s32.totalorder %s362_s17, 1 }
   0x8   : > { %s606_s21 = scalar_select %p89_p1, %s542_s14, %s91_s19  }
   0x9   : > { %p608_p5 = por %p102_p2, %p101_p0  ;;  %p612_p6 = por %p108_p4, %p107_p3 }
   0xa   : > { %p365_p7 = scmp.ge.s32.totalorder %s546_s15, 1  ;;  %p140_p8 = scmp.lt.s32.totalorder %s546_s15, 3 }
   0xc   : > { %p141_p9 = pnand %p365_p7, %p140_p8 }
   0xd   : > { %v187_v0 = vld [vmem:[%s774_s1 + $0x80] sm:$0xff] (!%p141_p9)  ;;  %v188_v1 = vld [vmem:[%s774_s1 + $0x88] sm:$0xff] (!%p141_p9)  ;;  %p164_p10 = scmp.lt.s32.totalorder (!%p141_p9), %s591_s16, 1  ;;  %v189_v5 = vld [vmem:[%s774_s1 + $0x90] sm:$0xff] (!%p141_p9)  ;;  %s548_s25 = smov (!%p141_p9), 64   ;;  %vm284_vm0 = vcmask (!%p141_p9), 523264  }
   0xe   : > { %144 = sbr.rel (%p141_p9) target bundleno = 395 (0x18b), region = 32  ;;  %v171_v2 = vld [vmem:[%s774_s1] sm:$0xff] (!%p141_p9)  ;;  %v412_v3 = vpack.c.bf16 (!%p141_p9), %v188_v1, %v187_v0  ;;  %v172_v4 = vld [vmem:[%s774_s1 + $0x8] sm:$0xff] (!%p141_p9)  ;;  %v190_v6 = vld [vmem:[%s774_s1 + $0x98] sm:$0xff] (!%p141_p9)  ;;  %s161_s26 = sand.u32 (!%p141_p9), 1, %s538_s13  }
   0xf   : > { %v414_v7 = vpack.c.bf16 (!%p141_p9), %v172_v4, %v171_v2  ;;  %v416_v8 = vpack.c.bf16 (!%p141_p9), %v190_v6, %v189_v5  ;;  %v173_v9 = vld [vmem:[%s774_s1 + $0x10] sm:$0xff] (!%p141_p9)  ;;  %v174_v10 = vld [vmem:[%s774_s1 + $0x18] sm:$0xff] (!%p141_p9)  ;;  %v191_v11 = vld [vmem:[%s774_s1 + $0xa0] sm:$0xff] (!%p141_p9)  ;;  %s366_s28 = sshll.u32 (!%p141_p9), %s161_s26, 4  ;;  %s289_s6 = scalar_lea.sflag (!%p141_p9), [#allocation3], %s161_s26 }
  0x10   : > { %413 = vmatprep.subr.bf16.mxu0 (!%p141_p9), %v412_v3  ;;  %v192_v12 = vld [vmem:[%s774_s1 + $0xa8] sm:$0xff] (!%p141_p9)  ;;  %v418_v13 = vpack.c.bf16 (!%p141_p9), %v174_v10, %v173_v9  ;;  %v175_v15 = vld [vmem:[%s774_s1 + $0x20] sm:$0xff] (!%p141_p9)  ;;  %v193_v17 = vld [vmem:[%s774_s1 + $0xb0] sm:$0xff] (!%p141_p9)  ;;  %s163_s29 = scalar_lea.vmem (!%p141_p9), [#allocation2], %s366_s28 }
  0x11   : > { %415 = vmatpush3.bf16.msra.mxu0 (!%p141_p9), %v414_v7  ;;  %v420_v14 = vpack.c.bf16 (!%p141_p9), %v192_v12, %v191_v11  ;;  %v176_v16 = vld [vmem:[%s774_s1 + $0x28] sm:$0xff] (!%p141_p9)  ;;  %v194_v18 = vld [vmem:[%s774_s1 + $0xb8] sm:$0xff] (!%p141_p9)  ;;  %v177_v21 = vld [vmem:[%s774_s1 + $0x30] sm:$0xff] (!%p141_p9)  ;;  %s303_s30 = sshll.u32 (!%p141_p9), %s163_s29, 4  ;;  %s733_s30 = int_to_ptr.vmem [resolvable:$true] %s303_s30 }
  0x12   : > { %417 = vmatprep.subr.bf16.mxu0 (!%p141_p9), %v416_v8  ;;  %v422_v19 = vpack.c.bf16 (!%p141_p9), %v176_v16, %v175_v15  ;;  %v424_v20 = vpack.c.bf16 (!%p141_p9), %v194_v18, %v193_v17  ;;  %v178_v22 = vld [vmem:[%s774_s1 + $0x38] sm:$0xff] (!%p141_p9)  ;;  %v195_v23 = vld [vmem:[%s774_s1 + $0xc0] sm:$0xff] (!%p141_p9)  ;;  %v196_v24 = vld [vmem:[%s774_s1 + $0xc8] sm:$0xff] (!%p141_p9)  ;;  %s484_s7 = scalar_lea.vmem (!%p141_p9), %s733_s30, 256 }
  0x13   : > { %v426_v26 = vpack.c.bf16 (!%p141_p9), %v178_v22, %v177_v21  ;;  %v428_v27 = vpack.c.bf16 (!%p141_p9), %v196_v24, %v195_v23  ;;  %v179_v28 = vld [vmem:[%s774_s1 + $0x40] sm:$0xff] (!%p141_p9)  ;;  %v180_v29 = vld [vmem:[%s774_s1 + $0x48] sm:$0xff] (!%p141_p9)  ;;  %v197_v30 = vld [vmem:[%s774_s1 + $0xd0] sm:$0xff] (!%p141_p9)  ;;  %p485_p11 = scmp.ne.s32.totalorder (!%p141_p9), %s733_s30, %s484_s7 }
  0x14   : > { %v198_v31 = vld [vmem:[%s774_s1 + $0xd8] sm:$0xff] (!%p141_p9)  ;;  %v430_v32 = vpack.c.bf16 (!%p141_p9), %v180_v29, %v179_v28  ;;  %v181_v34 = vld [vmem:[%s774_s1 + $0x50] sm:$0xff] (!%p141_p9)  ;;  %v199_v36 = vld [vmem:[%s774_s1 + $0xe0] sm:$0xff] (!%p141_p9) }
  0x15   : > { %s165_s24 = scalar_select %p164_p10, %s591_s16, 1  ;;  %419 = vmatpush3.bf16.msra.mxu0 %v418_v13  ;;  %v432_v33 = vpack.c.bf16 %v198_v31, %v197_v30  ;;  %v182_v35 = vld [vmem:[%s774_s1 + $0x58] sm:$0xff]  ;;  %v200_v37 = vld [vmem:[%s774_s1 + $0xe8] sm:$0xff]  ;;  %v183_v40 = vld [vmem:[%s774_s1 + $0x60] sm:$0xff] }
  0x16   : > { %421 = vmatprep.subr.bf16.mxu0 %v420_v14  ;;  %v434_v38 = vpack.c.bf16 %v182_v35, %v181_v34  ;;  %v436_v39 = vpack.c.bf16 %v200_v37, %v199_v36  ;;  %v184_v41 = vld [vmem:[%s774_s1 + $0x68] sm:$0xff]  ;;  %v201_v42 = vld [vmem:[%s774_s1 + $0xf0] sm:$0xff]  ;;  %v202_v43 = vld [vmem:[%s774_s1 + $0xf8] sm:$0xff]  ;;  %p486_p12 = pnand %p485_p11, %p608_p5 }
  0x17   : > { %s375_s27 = sshll.u32 %s165_s24, 4  ;;  %v438_v44 = vpack.c.bf16 %v184_v41, %v183_v40  ;;  %v440_v45 = vpack.c.bf16 %v202_v43, %v201_v42  ;;  %v185_v46 = vld [vmem:[%s774_s1 + $0x70] sm:$0xff]  ;;  %v186_v47 = vld [vmem:[%s774_s1 + $0x78] sm:$0xff]  ;;  %v369_v52 = vld [vmem:[%s775_s2] ss:$0 sm:$0xff] }
  0x18   : > { %s665_s11 = scalar_lea.vmem %s773_s0, %s375_s27  ;;  %v442_v48 = vpack.c.bf16 %v186_v47, %v185_v46  ;;  %s376_s27 = sshll.u32 %s591_s16, 8 }
  0x19   : > { %v170_v25 = vld [vmem:[%s665_s11 + $0x8] sm:$0xff]  ;;  %423 = vmatpush3.bf16.msra.mxu0 %v422_v19  ;;  %v169_v49 = vld [vmem:[%s665_s11] sm:$0xff]  ;;  %s731_s5 = scalar_lea.hbm %s776_s3, %s376_s27  ;;  %p487_p13 = pneg %p486_p12 }
  0x1a   : > { %274 = vmatprep.mubr.f32.mxu0 %v170_v25  ;;  %425 = vmatprep.subr.bf16.mxu0 %v424_v20  ;;  %s549_s16 = smov [#allocation2]  }
  0x1b   : > { %s488_s8 = sshll.u32 %s549_s16, 4  ;;  %s489_s8 = int_to_ptr.vmem [resolvable:$false] %s488_s8 }
  0x1c   : > { %s490_s9 = scalar_lea.vmem %s489_s8, 512  ;;  %p491_p0 = scmp.lt.s32.totalorder %s733_s30, %s489_s8 }
  0x1d   : > { %427 = vmatpush3.bf16.msra.mxu0 %v426_v26  ;;  %p492_p1 = scmp.lt.s32.totalorder %s490_s9, %s484_s7 }
  0x1e   : > { %429 = vmatprep.subr.bf16.mxu0 %v428_v27 }
  0x1f   : > { %p493_p2 = por %p492_p1, %p491_p0 }
  0x21   : > { %431 = vmatpush3.bf16.msra.mxu0 %v430_v32  ;;  %p494_p3 = pnand %p493_p2, %p487_p13 }
  0x22   : > { %433 = vmatprep.subr.bf16.mxu0 %v432_v33 }
  0x25   : > { %435 = vmatpush3.bf16.msra.mxu0 %v434_v38 }
  0x26   : > { %437 = vmatprep.subr.bf16.mxu0 %v436_v39 }
  0x29   : > { %439 = vmatpush3.bf16.msra.mxu0 %v438_v44 }
  0x2a   : > { %441 = vmatprep.subr.bf16.mxu0 %v440_v45 }
  0x2d   : > { %443 = vmatpush3.bf16.msra.mxu0 %v442_v48 }
  0x30   : > { %275 = vmatmul.mubr.f32.vlgmr.msra.gmra.mrb[0].mxu0 %v169_v49 }
 0x103   : > { %v409_v50 = vpop.f32.mrb[0].mxu0 }
 0x104   : > { %v410_v51 = vpop.f32.mrb[1].mxu0 }
 0x105   : > { %v411_v53 = vadd.f32 %v410_v51, %v409_v50 }
 0x107   : > { %v277_v54 = vadd.f32 %v411_v53, %v369_v52 }
 0x109   : > { %281 = vrot.lane.b32.xlu0 %v277_v54, %s548_s25 }
 0x17b   : > { %v282_v55 = vpop.permute.xlu0 %281 }
 0x17c   : > { %v285_v56 = vsel %vm284_vm0, %v277_v54, %v282_v55 }
 0x17d   : > { %286 = vst [vmem:[%s163_s29] sm:$0xff] %v285_v56  ;;  %287 = vst [vmem:[%s163_s29 + $0x8] sm:$0xff] %v285_v56 }
 0x17e   : > { %497 = shalt.err (!%p494_p3)
}
 0x17f   : > { %s498_s10 = scalar_lea.hbm %s731_s5, 256  ;;  %s502_s20 = scalar_lea.hbm %s776_s3, 512 }
 0x180   : > { %p499_p4 = scmp.ne.s32.totalorder %s731_s5, %s498_s10  ;;  %p503_p9 = scmp.lt.u32.totalorder %s731_s5, %s776_s3 }
 0x181   : > { %p504_p10 = scmp.lt.u32.totalorder %s502_s20, %s498_s10  ;;  %p506_p12 = scmp.lt.u32.totalorder %s498_s10, %s731_s5 }
 0x182   : > { %p500_p7 = pnand %p499_p4, %p608_p5 }
 0x183   : > { %p505_p11 = por %p504_p10, %p503_p9 }
 0x184   : > { %p501_p8 = pneg %p500_p7 }
 0x185   : > { %p507_p13 = por %p506_p12, %p505_p11 }
 0x187   : > { %p508_p0 = pnand %p507_p13, %p501_p8 }
 0x189   : > { %511 = shalt.err (!%p508_p0)
}
 0x18a   : > { %444 = dma.vmem_to_hbm [thread:$0]  (%p608_p5), %s733_s30, 256, %s731_s5, %s289_s6  }
 0x18b PF: > { %p450_p1 = scmp.ge.s32.totalorder %s546_s15, 2  ;;  %s315_s26 = sand.u32 1, %s534_s12  }
 0x18c   : > { %s316_s28 = scalar_lea.sflag [#allocation3], %s315_s26 }
 0x18d   : > { %p447_p2 = pnand %p450_p1, %p612_p6 }
 0x18f   : > { %529 = dma.done.wait (!%p447_p2), %s316_s28, 256  }
 0x190   : > { %531 = vsyncadd (!%p447_p2), %s316_s28, 4294967040  ;;  %p13_p3 = scmp.ge.s32.totalorder %s595_s18, 4   ;;  %s779_s12 = smov %s538_s13 }
 0x191   : > { %s780_s13 = smov %s542_s14  ;;  %s781_s14 = smov %s606_s21 }
 0x192   : > { %s782_s15 = smov %s595_s18  ;;  %15 = sbr.rel (!%p13_p3) target bundleno = 3 (0x3), region = 67 }
 0x199   :  { %321 = vsyncpa [#allocation3], 1 }
 0x19a   :  { %323 = vsyncpa [#allocation3 + $0x1], 1 }

</bundles_post_ra>
